<compile_context>
chip_gen: v7x
topology: tpu7x:2x2x1
jax: 0.10.0
libtpu: 0.0.40
codegen_flags: <defaults>
</compile_context>

<pallas_src>
import functools
import math

import jax
import jax.numpy as jnp
from jax.experimental import pallas as pl
from jax.experimental.pallas import tpu as pltpu

LANE = 128
NEG_INF = -1e30


# ------------------------------- fused kernel ------------------------------- #

def evpg_fused_kernel(
    obs_ref, obs_act_ref, noise_ref,            # (TB, obs_dim), (TB, va_pad), (TB, 128)
    pw1_ref, pb1_ref, pw2_ref, pb2_ref, pw3_ref, pb3_ref,   # policy net (last layer 128-wide padded)
    vw1_ref, vb1_ref, vw2_ref, vb2_ref,         # value net (last layer 128-wide padded)
    q_ref, logits_ref, gs_ref,                  # (TB, 128) each (lane-dense stores)
    *, temperature: float,
):
    f32 = jnp.float32

    # ---- value_net: Linear -> Tanh -> Linear ----
    vh = jnp.tanh(
        jnp.dot(obs_act_ref[...], vw1_ref[...], preferred_element_type=f32)
        + vb1_ref[...]
    )
    q_ref[...] = jnp.dot(vh, vw2_ref[...], preferred_element_type=f32) + vb2_ref[...]

    # ---- policy_net: Linear -> Tanh -> Linear -> Tanh -> Linear (computed ONCE) ----
    h1 = jnp.tanh(
        jnp.dot(obs_ref[...], pw1_ref[...], preferred_element_type=f32) + pb1_ref[...]
    )
    h2 = jnp.tanh(
        jnp.dot(h1, pw2_ref[...], preferred_element_type=f32) + pb2_ref[...]
    )
    logits = jnp.dot(h2, pw3_ref[...], preferred_element_type=f32) + pb3_ref[...]
    logits_ref[...] = logits        # padded lanes hold -1e30, sliced off in the wrapper

    # ---- gumbel-softmax on the SAME logits (uniform noise streamed in) ----
    # TODO(synk): torch.rand draws from a global stateful RNG per call; here the noise is
    # deterministic given the wrapper seed (drawn host-side with jax.random.uniform).
    eps = 1e-20
    u = noise_ref[...]
    g = -jnp.log(-jnp.log(u + eps) + eps)       # sample_gumbel
    y = (logits + g) * (1.0 / temperature)      # gumbel_softmax_sample
    y = y - jnp.max(y, axis=-1, keepdims=True)  # padded lanes stay ~-1e30 -> exp == 0
    e = jnp.exp(y)
    s = jnp.sum(e, axis=-1, keepdims=True)
    gs_ref[...] = e / s


# --------------------------------- wrapper ---------------------------------- #

def _round_up(x: int, m: int) -> int:
    return ((x + m - 1) // m) * m


def evpg_forward(obs, obs_act, policy_params, value_params, temperature, seed,
                 row_tile: int = 256):
    """Fused EVPG forward.

    Returns:
      Q      = value_net(obs_act)                              -> (B, 1)
      logits = policy_net(obs)                                 -> (B, act_dim)
      gs     = softmax((logits + gumbel_noise) / temperature)  -> (B, act_dim)
    """
    pw1, pb1, pw2, pb2, pw3, pb3 = policy_params
    vw1, vb1, vw2, vb2 = value_params

    B, obs_dim = obs.shape
    act_dim = pw3.shape[1]

    # Host-side padding (zeros / -inf) keeps results exact while making the MXU N-dim and
    # every output store lane-dense (128 wide, unmasked).
    va_in = obs_act.shape[1]
    va_pad = _round_up(va_in, 8)
    obs_act_p = jnp.pad(obs_act, ((0, 0), (0, va_pad - va_in)))
    vw1_p = jnp.pad(vw1, ((0, va_pad - va_in), (0, 0)))

    pw3_p = jnp.pad(pw3, ((0, 0), (0, LANE - act_dim)))
    pb3_p = jnp.pad(pb3, ((0, 0), (0, LANE - act_dim)), constant_values=NEG_INF)
    vw2_p = jnp.pad(vw2, ((0, 0), (0, LANE - 1)))
    vb2_p = jnp.pad(vb2, ((0, 0), (0, LANE - 1)))

    # Batch tiling: stream activation rows, keep the (tiny) weights VMEM-resident.
    TB = min(row_tile, _round_up(B, 8))
    Bp = _round_up(B, TB)
    obs_p = jnp.pad(obs, ((0, Bp - B), (0, 0)))
    obs_act_p = jnp.pad(obs_act_p, ((0, Bp - B), (0, 0)))

    # Uniform [0,1) gumbel noise, drawn host-side (one lane-dense slab, streamed in).
    noise = jax.random.uniform(jax.random.PRNGKey(int(seed)), (Bp, LANE), jnp.float32)

    def row_spec(cols):
        return pl.BlockSpec((TB, cols), lambda i: (i, 0))

    def const_spec(arr):
        return pl.BlockSpec(arr.shape, lambda i: (0, 0))   # resident across grid steps

    out128 = jax.ShapeDtypeStruct((Bp, LANE), jnp.float32)

    q_p, logits_p, gs_p = pl.pallas_call(
        functools.partial(evpg_fused_kernel, temperature=float(temperature)),
        out_shape=(out128, out128, out128),
        grid=(Bp // TB,),
        in_specs=[
            row_spec(obs_dim),
            row_spec(va_pad),
            row_spec(LANE),
            const_spec(pw1), const_spec(pb1),
            const_spec(pw2), const_spec(pb2),
            const_spec(pw3_p), const_spec(pb3_p),
            const_spec(vw1_p), const_spec(vb1),
            const_spec(vw2_p), const_spec(vb2_p),
        ],
        out_specs=(row_spec(LANE), row_spec(LANE), row_spec(LANE)),
        compiler_params=pltpu.CompilerParams(dimension_semantics=("parallel",)),
    )(obs_p, obs_act_p, noise,
      pw1, pb1, pw2, pb2, pw3_p, pb3_p,
      vw1_p, vb1, vw2_p, vb2_p)

    return q_p[:B, :1], logits_p[:B, :act_dim], gs_p[:B, :act_dim]


# ------------------------- deterministic param init ------------------------- #

def init_linear(key, fan_in, fan_out):
    """Mimic torch.nn.Linear default init: U(-1/sqrt(fan_in), 1/sqrt(fan_in))."""
    kw, kb = jax.random.split(key)
    bound = 1.0 / math.sqrt(fan_in)
    w = jax.random.uniform(kw, (fan_in, fan_out), jnp.float32, -bound, bound)
    b = jax.random.uniform(kb, (1, fan_out), jnp.float32, -bound, bound)
    return w, b


# ----------------------------------- main ------------------------------------ #

if __name__ == "__main__":
    obs_dim, act_dim = 8, 4
    hidden_sizes = [32, 32]
    temperature = 1.0
    B = 8

    key = jax.random.PRNGKey(0)
    keys = jax.random.split(key, 8)

    # policy_net = mlp([obs_dim] + hidden_sizes + [act_dim], Tanh)
    p_w1, p_b1 = init_linear(keys[0], obs_dim, hidden_sizes[0])
    p_w2, p_b2 = init_linear(keys[1], hidden_sizes[0], hidden_sizes[1])
    p_w3, p_b3 = init_linear(keys[2], hidden_sizes[1], act_dim)
    policy_params = (p_w1, p_b1, p_w2, p_b2, p_w3, p_b3)

    # value_net = value_mlp(1 + obs_dim, hidden_sizes[0], Tanh)
    v_w1, v_b1 = init_linear(keys[3], 1 + obs_dim, hidden_sizes[0])
    v_w2, v_b2 = init_linear(keys[4], hidden_sizes[0], 1)
    value_params = (v_w1, v_b1, v_w2, v_b2)

    obs_act = jax.random.normal(keys[5], (B, 1 + obs_dim), jnp.float32)
    obs = jax.random.normal(keys[6], (B, obs_dim), jnp.float32)

    # --- fused forward: ONE kernel launch -> get_value, get_logits, get_action_gumbel_softmax ---
    Q, logits, gs = evpg_forward(obs, obs_act, policy_params, value_params,
                                 temperature, seed=42)

    # --- forward(obs) with obs_act=None (single obs) ---
    # TODO(synk): torch Categorical(logits).sample() is stochastic; sampled here with
    # jax.random.categorical on a fixed key (host-side glue, not in-kernel).
    single_obs = obs[0]
    act = jax.random.categorical(keys[7], logits[0])
    oa = jnp.concatenate([single_obs, act.astype(jnp.float32)[None]])      # [obs..., act]
    Q_single = evpg_forward(single_obs[None, :], oa[None, :], policy_params,
                            value_params, temperature, seed=7)[0][0, 0]

    # --- reference checks for the deterministic paths (loose tol: MXU matmul precision
    #     may differ from the XLA reference's default f32 matmul path) ---
    ref_Q = jnp.tanh(obs_act @ v_w1 + v_b1) @ v_w2 + v_b2
    ref_logits = jnp.tanh(jnp.tanh(obs @ p_w1 + p_b1) @ p_w2 + p_b2) @ p_w3 + p_b3
    assert jnp.allclose(Q, ref_Q, atol=2e-2, rtol=2e-2), "value head mismatch"
    assert jnp.allclose(logits, ref_logits, atol=2e-2, rtol=2e-2), "policy logits mismatch"
    assert jnp.allclose(jnp.sum(gs, axis=-1), jnp.ones((B,)), atol=1e-3), "softmax not normalized"
    assert bool(jnp.all(gs >= 0.0)), "softmax produced negative probabilities"

    jax.block_until_ready((Q, logits, gs, Q_single))
    print("KERNEL_OK")
</pallas_src>

<mosaic_0001>
module attributes {stable_mosaic.version = 11 : i64} {
  func.func @evpg_fused_kernel(%arg0: i32, %arg1: memref<8x8xf32, #tpu.memory_space<vmem>>, %arg2: memref<8x16xf32, #tpu.memory_space<vmem>>, %arg3: memref<8x128xf32, #tpu.memory_space<vmem>>, %arg4: memref<8x32xf32, #tpu.memory_space<vmem>>, %arg5: memref<1x32xf32, #tpu.memory_space<vmem>>, %arg6: memref<32x32xf32, #tpu.memory_space<vmem>>, %arg7: memref<1x32xf32, #tpu.memory_space<vmem>>, %arg8: memref<32x128xf32, #tpu.memory_space<vmem>>, %arg9: memref<1x128xf32, #tpu.memory_space<vmem>>, %arg10: memref<16x32xf32, #tpu.memory_space<vmem>>, %arg11: memref<1x32xf32, #tpu.memory_space<vmem>>, %arg12: memref<32x128xf32, #tpu.memory_space<vmem>>, %arg13: memref<1x128xf32, #tpu.memory_space<vmem>>, %arg14: memref<8x128xf32, #tpu.memory_space<vmem>>, %arg15: memref<8x128xf32, #tpu.memory_space<vmem>>, %arg16: memref<8x128xf32, #tpu.memory_space<vmem>>) attributes {dimension_semantics = [#tpu.dimension_semantics<parallel>], iteration_bounds = array<i64: 1>, scalar_prefetch = 0 : i64, scratch_operands = 0 : i64, tpu.core_type = #tpu.core_type<tc>, window_params = [{transform_indices = @transform_0, window_bounds = array<i64: 8, 8>}, {transform_indices = @transform_1, window_bounds = array<i64: 8, 16>}, {transform_indices = @transform_2, window_bounds = array<i64: 8, 128>}, {pipeline_mode = #tpu.pipeline_mode<synchronous>, transform_indices = @transform_3, window_bounds = array<i64: 8, 32>}, {pipeline_mode = #tpu.pipeline_mode<synchronous>, transform_indices = @transform_4, window_bounds = array<i64: 1, 32>}, {pipeline_mode = #tpu.pipeline_mode<synchronous>, transform_indices = @transform_5, window_bounds = array<i64: 32, 32>}, {pipeline_mode = #tpu.pipeline_mode<synchronous>, transform_indices = @transform_6, window_bounds = array<i64: 1, 32>}, {pipeline_mode = #tpu.pipeline_mode<synchronous>, transform_indices = @transform_7, window_bounds = array<i64: 32, 128>}, {pipeline_mode = #tpu.pipeline_mode<synchronous>, transform_indices = @transform_8, window_bounds = array<i64: 1, 128>}, {pipeline_mode = #tpu.pipeline_mode<synchronous>, transform_indices = @transform_9, window_bounds = array<i64: 16, 32>}, {pipeline_mode = #tpu.pipeline_mode<synchronous>, transform_indices = @transform_10, window_bounds = array<i64: 1, 32>}, {pipeline_mode = #tpu.pipeline_mode<synchronous>, transform_indices = @transform_11, window_bounds = array<i64: 32, 128>}, {pipeline_mode = #tpu.pipeline_mode<synchronous>, transform_indices = @transform_12, window_bounds = array<i64: 1, 128>}, {transform_indices = @transform_13, window_bounds = array<i64: 8, 128>}, {transform_indices = @transform_14, window_bounds = array<i64: 8, 128>}, {transform_indices = @transform_15, window_bounds = array<i64: 8, 128>}]} {
    %c0 = arith.constant 0 : index
    %c0_0 = arith.constant 0 : index
    %0 = vector.load %arg2[%c0, %c0_0] : memref<8x16xf32, #tpu.memory_space<vmem>>, vector<8x16xf32>
    %c0_1 = arith.constant 0 : index
    %c0_2 = arith.constant 0 : index
    %1 = vector.load %arg10[%c0_1, %c0_2] : memref<16x32xf32, #tpu.memory_space<vmem>>, vector<16x32xf32>
    %cst = arith.constant dense<0.000000e+00> : vector<8x32xf32>
    %2 = tpu.matmul %0, %1, %cst {dimension_numbers = #tpu.dot_dimension_numbers<[1], [0], [0], [1], [0, 0, 1, 1], [], []>} : vector<8x16xf32>, vector<16x32xf32>, vector<8x32xf32> -> vector<8x32xf32>
    %c0_3 = arith.constant 0 : index
    %c0_4 = arith.constant 0 : index
    %3 = vector.load %arg11[%c0_3, %c0_4] : memref<1x32xf32, #tpu.memory_space<vmem>>, vector<1x32xf32>
    %4 = vector.broadcast %3 : vector<1x32xf32> to vector<8x32xf32>
    %5 = arith.addf %2, %4 : vector<8x32xf32>
    %6 = math.tanh %5 : vector<8x32xf32>
    %c0_5 = arith.constant 0 : index
    %c0_6 = arith.constant 0 : index
    %7 = vector.load %arg12[%c0_5, %c0_6] : memref<32x128xf32, #tpu.memory_space<vmem>>, vector<32x128xf32>
    %cst_7 = arith.constant dense<0.000000e+00> : vector<8x128xf32>
    %8 = tpu.matmul %6, %7, %cst_7 {dimension_numbers = #tpu.dot_dimension_numbers<[1], [0], [0], [1], [0, 0, 1, 1], [], []>} : vector<8x32xf32>, vector<32x128xf32>, vector<8x128xf32> -> vector<8x128xf32>
    %c0_8 = arith.constant 0 : index
    %c0_9 = arith.constant 0 : index
    %9 = vector.load %arg13[%c0_8, %c0_9] : memref<1x128xf32, #tpu.memory_space<vmem>>, vector<1x128xf32>
    %10 = vector.broadcast %9 : vector<1x128xf32> to vector<8x128xf32>
    %11 = arith.addf %8, %10 : vector<8x128xf32>
    %c0_10 = arith.constant 0 : index
    %c0_11 = arith.constant 0 : index
    %12 = vector.load %arg14[%c0_10, %c0_11] : memref<8x128xf32, #tpu.memory_space<vmem>>, vector<8x128xf32>
    tpu.vector_store %arg14[%c0_10, %c0_11], %11 {strides = array<i32>} : memref<8x128xf32, #tpu.memory_space<vmem>>, vector<8x128xf32>,
    %c0_12 = arith.constant 0 : index
    %c0_13 = arith.constant 0 : index
    %13 = vector.load %arg1[%c0_12, %c0_13] : memref<8x8xf32, #tpu.memory_space<vmem>>, vector<8x8xf32>
    %c0_14 = arith.constant 0 : index
    %c0_15 = arith.constant 0 : index
    %14 = vector.load %arg4[%c0_14, %c0_15] : memref<8x32xf32, #tpu.memory_space<vmem>>, vector<8x32xf32>
    %cst_16 = arith.constant dense<0.000000e+00> : vector<8x32xf32>
    %15 = tpu.matmul %13, %14, %cst_16 {dimension_numbers = #tpu.dot_dimension_numbers<[1], [0], [0], [1], [0, 0, 1, 1], [], []>} : vector<8x8xf32>, vector<8x32xf32>, vector<8x32xf32> -> vector<8x32xf32>
    %c0_17 = arith.constant 0 : index
    %c0_18 = arith.constant 0 : index
    %16 = vector.load %arg5[%c0_17, %c0_18] : memref<1x32xf32, #tpu.memory_space<vmem>>, vector<1x32xf32>
    %17 = vector.broadcast %16 : vector<1x32xf32> to vector<8x32xf32>
    %18 = arith.addf %15, %17 : vector<8x32xf32>
    %19 = math.tanh %18 : vector<8x32xf32>
    %c0_19 = arith.constant 0 : index
    %c0_20 = arith.constant 0 : index
    %20 = vector.load %arg6[%c0_19, %c0_20] : memref<32x32xf32, #tpu.memory_space<vmem>>, vector<32x32xf32>
    %cst_21 = arith.constant dense<0.000000e+00> : vector<8x32xf32>
    %21 = tpu.matmul %19, %20, %cst_21 {dimension_numbers = #tpu.dot_dimension_numbers<[1], [0], [0], [1], [0, 0, 1, 1], [], []>} : vector<8x32xf32>, vector<32x32xf32>, vector<8x32xf32> -> vector<8x32xf32>
    %c0_22 = arith.constant 0 : index
    %c0_23 = arith.constant 0 : index
    %22 = vector.load %arg7[%c0_22, %c0_23] : memref<1x32xf32, #tpu.memory_space<vmem>>, vector<1x32xf32>
    %23 = vector.broadcast %22 : vector<1x32xf32> to vector<8x32xf32>
    %24 = arith.addf %21, %23 : vector<8x32xf32>
    %25 = math.tanh %24 : vector<8x32xf32>
    %c0_24 = arith.constant 0 : index
    %c0_25 = arith.constant 0 : index
    %26 = vector.load %arg8[%c0_24, %c0_25] : memref<32x128xf32, #tpu.memory_space<vmem>>, vector<32x128xf32>
    %cst_26 = arith.constant dense<0.000000e+00> : vector<8x128xf32>
    %27 = tpu.matmul %25, %26, %cst_26 {dimension_numbers = #tpu.dot_dimension_numbers<[1], [0], [0], [1], [0, 0, 1, 1], [], []>} : vector<8x32xf32>, vector<32x128xf32>, vector<8x128xf32> -> vector<8x128xf32>
    %c0_27 = arith.constant 0 : index
    %c0_28 = arith.constant 0 : index
    %28 = vector.load %arg9[%c0_27, %c0_28] : memref<1x128xf32, #tpu.memory_space<vmem>>, vector<1x128xf32>
    %29 = vector.broadcast %28 : vector<1x128xf32> to vector<8x128xf32>
    %30 = arith.addf %27, %29 : vector<8x128xf32>
    %c0_29 = arith.constant 0 : index
    %c0_30 = arith.constant 0 : index
    %31 = vector.load %arg15[%c0_29, %c0_30] : memref<8x128xf32, #tpu.memory_space<vmem>>, vector<8x128xf32>
    tpu.vector_store %arg15[%c0_29, %c0_30], %30 {strides = array<i32>} : memref<8x128xf32, #tpu.memory_space<vmem>>, vector<8x128xf32>,
    %c0_31 = arith.constant 0 : index
    %c0_32 = arith.constant 0 : index
    %32 = vector.load %arg3[%c0_31, %c0_32] : memref<8x128xf32, #tpu.memory_space<vmem>>, vector<8x128xf32>
    %cst_33 = arith.constant 9.99999968E-21 : f32
    %33 = vector.broadcast %cst_33 : f32 to vector<8x128xf32>
    %34 = arith.addf %32, %33 : vector<8x128xf32>
    %35 = math.log %34 : vector<8x128xf32>
    %cst_34 = arith.constant 0.000000e+00 : f32
    %36 = vector.broadcast %cst_34 : f32 to vector<8x128xf32>
    %37 = arith.subf %36, %35 : vector<8x128xf32>
    %cst_35 = arith.constant 9.99999968E-21 : f32
    %38 = vector.broadcast %cst_35 : f32 to vector<8x128xf32>
    %39 = arith.addf %37, %38 : vector<8x128xf32>
    %40 = math.log %39 : vector<8x128xf32>
    %cst_36 = arith.constant 0.000000e+00 : f32
    %41 = vector.broadcast %cst_36 : f32 to vector<8x128xf32>
    %42 = arith.subf %41, %40 : vector<8x128xf32>
    %43 = arith.addf %30, %42 : vector<8x128xf32>
    %cst_37 = arith.constant 1.000000e+00 : f32
    %44 = vector.broadcast %cst_37 : f32 to vector<8x128xf32>
    %45 = arith.mulf %43, %44 : vector<8x128xf32>
    %cst_38 = arith.constant dense<0xFF800000> : vector<8xf32>
    %46 = vector.multi_reduction <maximumf>, %45, %cst_38 [1] : vector<8x128xf32> to vector<8xf32>
    %47 = vector.shape_cast %46 : vector<8xf32> to vector<8x1xf32>
    %48 = vector.broadcast %47 : vector<8x1xf32> to vector<8x128xf32>
    %49 = arith.subf %45, %48 : vector<8x128xf32>
    %50 = math.exp %49 : vector<8x128xf32>
    %cst_39 = arith.constant dense<0.000000e+00> : vector<8xf32>
    %51 = vector.multi_reduction <add>, %50, %cst_39 [1] : vector<8x128xf32> to vector<8xf32>
    %52 = vector.shape_cast %51 : vector<8xf32> to vector<8x1xf32>
    %53 = vector.broadcast %52 : vector<8x1xf32> to vector<8x128xf32>
    %54 = arith.divf %50, %53 : vector<8x128xf32>
    %c0_40 = arith.constant 0 : index
    %c0_41 = arith.constant 0 : index
    %55 = vector.load %arg16[%c0_40, %c0_41] : memref<8x128xf32, #tpu.memory_space<vmem>>, vector<8x128xf32>
    tpu.vector_store %arg16[%c0_40, %c0_41], %54 {strides = array<i32>} : memref<8x128xf32, #tpu.memory_space<vmem>>, vector<8x128xf32>,
    return
  }
  func.func @transform_0(%arg0: i32) -> (i32, i32) {
    %c0_i32 = arith.constant 0 : i32
    %c0_i32_0 = arith.constant 0 : i32
    return %arg0, %c0_i32 : i32, i32
  }
  func.func @transform_1(%arg0: i32) -> (i32, i32) {
    %c0_i32 = arith.constant 0 : i32
    %c0_i32_0 = arith.constant 0 : i32
    return %arg0, %c0_i32 : i32, i32
  }
  func.func @transform_2(%arg0: i32) -> (i32, i32) {
    %c0_i32 = arith.constant 0 : i32
    %c0_i32_0 = arith.constant 0 : i32
    return %arg0, %c0_i32 : i32, i32
  }
  func.func @transform_3(%arg0: i32) -> (i32, i32) {
    %c0_i32 = arith.constant 0 : i32
    %c0_i32_0 = arith.constant 0 : i32
    %c0_i32_1 = arith.constant 0 : i32
    return %c0_i32, %c0_i32_0 : i32, i32
  }
  func.func @transform_4(%arg0: i32) -> (i32, i32) {
    %c0_i32 = arith.constant 0 : i32
    %c0_i32_0 = arith.constant 0 : i32
    %c0_i32_1 = arith.constant 0 : i32
    return %c0_i32, %c0_i32_0 : i32, i32
  }
  func.func @transform_5(%arg0: i32) -> (i32, i32) {
    %c0_i32 = arith.constant 0 : i32
    %c0_i32_0 = arith.constant 0 : i32
    %c0_i32_1 = arith.constant 0 : i32
    return %c0_i32, %c0_i32_0 : i32, i32
  }
  func.func @transform_6(%arg0: i32) -> (i32, i32) {
    %c0_i32 = arith.constant 0 : i32
    %c0_i32_0 = arith.constant 0 : i32
    %c0_i32_1 = arith.constant 0 : i32
    return %c0_i32, %c0_i32_0 : i32, i32
  }
  func.func @transform_7(%arg0: i32) -> (i32, i32) {
    %c0_i32 = arith.constant 0 : i32
    %c0_i32_0 = arith.constant 0 : i32
    %c0_i32_1 = arith.constant 0 : i32
    return %c0_i32, %c0_i32_0 : i32, i32
  }
  func.func @transform_8(%arg0: i32) -> (i32, i32) {
    %c0_i32 = arith.constant 0 : i32
    %c0_i32_0 = arith.constant 0 : i32
    %c0_i32_1 = arith.constant 0 : i32
    return %c0_i32, %c0_i32_0 : i32, i32
  }
  func.func @transform_9(%arg0: i32) -> (i32, i32) {
    %c0_i32 = arith.constant 0 : i32
    %c0_i32_0 = arith.constant 0 : i32
    %c0_i32_1 = arith.constant 0 : i32
    return %c0_i32, %c0_i32_0 : i32, i32
  }
  func.func @transform_10(%arg0: i32) -> (i32, i32) {
    %c0_i32 = arith.constant 0 : i32
    %c0_i32_0 = arith.constant 0 : i32
    %c0_i32_1 = arith.constant 0 : i32
    return %c0_i32, %c0_i32_0 : i32, i32
  }
  func.func @transform_11(%arg0: i32) -> (i32, i32) {
    %c0_i32 = arith.constant 0 : i32
    %c0_i32_0 = arith.constant 0 : i32
    %c0_i32_1 = arith.constant 0 : i32
    return %c0_i32, %c0_i32_0 : i32, i32
  }
  func.func @transform_12(%arg0: i32) -> (i32, i32) {
    %c0_i32 = arith.constant 0 : i32
    %c0_i32_0 = arith.constant 0 : i32
    %c0_i32_1 = arith.constant 0 : i32
    return %c0_i32, %c0_i32_0 : i32, i32
  }
  func.func @transform_13(%arg0: i32) -> (i32, i32) {
    %c0_i32 = arith.constant 0 : i32
    %c0_i32_0 = arith.constant 0 : i32
    return %arg0, %c0_i32 : i32, i32
  }
  func.func @transform_14(%arg0: i32) -> (i32, i32) {
    %c0_i32 = arith.constant 0 : i32
    %c0_i32_0 = arith.constant 0 : i32
    return %arg0, %c0_i32 : i32, i32
  }
  func.func @transform_15(%arg0: i32) -> (i32, i32) {
    %c0_i32 = arith.constant 0 : i32
    %c0_i32_0 = arith.constant 0 : i32
    return %arg0, %c0_i32 : i32, i32
  }
}

</mosaic_0001>

<bundles_post_ra>
// kernel: tpu_custom_call.1
= control target key start
LH: loop header
LB: loop body
LE: loop exit
PB: predicated region body
PF: predicated region fallthrough
CT: control target
= control target key end

     0   :  { %21 = vsyncpa [#allocation3], 0  ;;  %s1355_s0 = inlined_call_operand.hbm [shape: f32[8,8], index: 0, kind: input, shape index: {}]   ;;  %s1356_s1 = inlined_call_operand.hbm [shape: f32[8,16], index: 1, kind: input, shape index: {}]   ;;  %s1357_s2 = inlined_call_operand.hbm [shape: f32[8,128], index: 2, kind: input, shape index: {}]   ;;  %s1358_s3 = inlined_call_operand.vmem [shape: f32[8,32], index: 3, kind: input, shape index: {}]   ;;  %s1359_s4 = inlined_call_operand.vmem [shape: f32[1,32], index: 4, kind: input, shape index: {}]   ;;  %s1360_s5 = inlined_call_operand.hbm [shape: f32[32,32], index: 5, kind: input, shape index: {}]   ;;  %s1361_s6 = inlined_call_operand.hbm [shape: f32[1,32], index: 6, kind: input, shape index: {}]   ;;  %s1362_s7 = inlined_call_operand.hbm [shape: f32[32,128], index: 7, kind: input, shape index: {}]   ;;  %s1363_s8 = inlined_call_operand.hbm [shape: f32[1,128], index: 8, kind: input, shape index: {}]   ;;  %s1364_s9 = inlined_call_operand.hbm [shape: f32[16,32], index: 9, kind: input, shape index: {}]   ;;  %s1365_s10 = inlined_call_operand.hbm [shape: f32[1,32], index: 10, kind: input, shape index: {}]   ;;  %s1366_s11 = inlined_call_operand.vmem [shape: f32[32,128], index: 11, kind: input, shape index: {}]   ;;  %s1367_s12 = inlined_call_operand.vmem [shape: f32[1,128], index: 12, kind: input, shape index: {}]   ;;  %s1368_s13 = inlined_call_operand.hbm [shape: f32[8,128], index: 13, kind: output, shape index: {0}]   ;;  %s1369_s14 = inlined_call_operand.hbm [shape: f32[8,128], index: 14, kind: output, shape index: {1}]   ;;  %s1370_s15 = inlined_call_operand.hbm [shape: f32[8,128], index: 15, kind: output, shape index: {2}]  }
   0x1   :  { %22 = vsyncpa [#allocation6], 0 }
   0x2   :  { %23 = vsyncpa [#allocation9], 0 }
   0x3   :  { %24 = vsyncpa [#allocation12], 0 }
   0x4   :  { %25 = vsyncpa [#allocation15], 0 }
   0x5   :  { %26 = vsyncpa [#allocation4], 0 }
   0x6   :  { %27 = vsyncpa [#allocation19], 0  ;;  %s1055_s18 = smov [#allocation5]   ;;  %s1056_s20 = smov [#allocation8]  }
   0x7   :  { %s44_s19 = sshll.u32 %s1055_s18, 4  ;;  %s67_s21 = sshll.u32 %s1056_s20, 4  ;;  %s45_s19 = int_to_ptr.vmem [resolvable:$true] %s44_s19  ;;  %s1152_s21 = int_to_ptr.vmem [resolvable:$true] %s67_s21 }
   0x8   :  { %s777_s24 = scalar_lea.hbm %s1356_s1, 128 }
   0x9   :  { %p778_p0 = scmp.ne.s32.totalorder %s1356_s1, %s777_s24  ;;  %p781_p1 = scmp.lt.u32.totalorder %s777_s24, %s1356_s1 }
   0xb   :  { %p783_p2 = pnand %p781_p1, %p778_p0 }
   0xd   :  { %786 = shalt.err (!%p783_p2)
}
   0xe   :  { %s787_s29 = scalar_lea.vmem %s45_s19, 128  ;;  %p792_p4 = scmp.lt.s32.totalorder %s45_s19, %s45_s19 }
   0xf   :  { %p788_p3 = scmp.ne.s32.totalorder %s45_s19, %s787_s29  ;;  %p793_p5 = scmp.lt.s32.totalorder %s787_s29, %s787_s29 }
  0x11   :  { %p794_p6 = por %p793_p5, %p792_p4 }
  0x13   :  { %p795_p7 = pnand %p794_p6, %p788_p3 }
  0x15   :  { %798 = shalt.err (!%p795_p7)
}
  0x16   :  { %47 = dma.hbm_to_vmem [thread:$0]  %s1356_s1, 128, %s45_s19, [#allocation6]  }
  0x17   :  { %s799_s20 = scalar_lea.hbm %s1360_s5, 512 }
  0x18   :  { %p800_p8 = scmp.ne.s32.totalorder %s1360_s5, %s799_s20  ;;  %p803_p9 = scmp.lt.u32.totalorder %s799_s20, %s1360_s5 }
  0x1a   :  { %p805_p10 = pnand %p803_p9, %p800_p8 }
  0x1c   :  { %808 = shalt.err (!%p805_p10)
}
  0x1d   :  { %s809_s26 = scalar_lea.vmem %s1152_s21, 512  ;;  %p814_p12 = scmp.lt.s32.totalorder %s1152_s21, %s1152_s21 }
  0x1e   :  { %p810_p11 = scmp.ne.s32.totalorder %s1152_s21, %s809_s26  ;;  %p815_p13 = scmp.lt.s32.totalorder %s809_s26, %s809_s26 }
  0x20   :  { %p816_p0 = por %p815_p13, %p814_p12 }
  0x22   :  { %p817_p1 = pnand %p816_p0, %p810_p11 }
  0x24   :  { %820 = shalt.err (!%p817_p1)
}
  0x25   :  { %s1057_s1 = smov 128   ;;  %s1058_s19 = smov 8  }
  0x26   :  { %73 = dma.hbm_to_vmem [thread:$0]  %s1360_s5, 512, %s1152_s21, [#allocation9], %s1057_s1, %s1057_s1, %s1058_s19  }
  0x27   :  { %s1059_s29 = smov [#allocation11]   ;;  %s1060_s16 = smov [#allocation14]  }
  0x28   :  { %s89_s30 = sshll.u32 %s1059_s29, 4  ;;  %s111_s17 = sshll.u32 %s1060_s16, 4  ;;  %s90_s30 = int_to_ptr.vmem [resolvable:$true] %s89_s30  ;;  %s1186_s17 = int_to_ptr.vmem [resolvable:$true] %s111_s17 }
  0x29   :  { %s821_s22 = scalar_lea.hbm %s1362_s7, 512 }
  0x2a   :  { %p822_p2 = scmp.ne.s32.totalorder %s1362_s7, %s821_s22  ;;  %p825_p3 = scmp.lt.u32.totalorder %s821_s22, %s1362_s7 }
  0x2c   :  { %p827_p4 = pnand %p825_p3, %p822_p2 }
  0x2e   :  { %830 = shalt.err (!%p827_p4)
}
  0x2f   :  { %s831_s5 = scalar_lea.vmem %s90_s30, 512  ;;  %p836_p6 = scmp.lt.s32.totalorder %s90_s30, %s90_s30 }
  0x30   :  { %p832_p5 = scmp.ne.s32.totalorder %s90_s30, %s831_s5  ;;  %p837_p7 = scmp.lt.s32.totalorder %s831_s5, %s831_s5 }
  0x32   :  { %p838_p8 = por %p837_p7, %p836_p6 }
  0x34   :  { %p839_p9 = pnand %p838_p8, %p832_p5 }
  0x36   :  { %842 = shalt.err (!%p839_p9)
}
  0x37   :  { %95 = dma.hbm_to_vmem [thread:$0]  %s1362_s7, 512, %s90_s30, [#allocation12], %s1057_s1, %s1057_s1, %s1058_s19  }
  0x38   :  { %s843_s16 = scalar_lea.hbm %s1364_s9, 256 }
  0x39   :  { %p844_p10 = scmp.ne.s32.totalorder %s1364_s9, %s843_s16  ;;  %p847_p11 = scmp.lt.u32.totalorder %s843_s16, %s1364_s9 }
  0x3b   :  { %p849_p12 = pnand %p847_p11, %p844_p10 }
  0x3d   :  { %852 = shalt.err (!%p849_p12)
}
  0x3e   :  { %s853_s24 = scalar_lea.vmem %s1186_s17, 256  ;;  %p858_p0 = scmp.lt.s32.totalorder %s1186_s17, %s1186_s17 }
  0x3f   :  { %p854_p13 = scmp.ne.s32.totalorder %s1186_s17, %s853_s24  ;;  %p859_p1 = scmp.lt.s32.totalorder %s853_s24, %s853_s24 }
  0x41   :  { %p860_p2 = por %p859_p1, %p858_p0 }
  0x43   :  { %p861_p3 = pnand %p860_p2, %p854_p13 }
  0x45   :  { %864 = shalt.err (!%p861_p3)
}
  0x46   :  { %117 = dma.hbm_to_vmem [thread:$0]  %s1364_s9, 256, %s1186_s17, [#allocation15], %s1057_s1, %s1057_s1, %s1058_s19  }
  0x47   :  { %s1061_s25 = smov [#allocation2]   ;;  %s1062_s5 = smov [#allocation7]  }
  0x48   :  { %s34_s26 = sshll.u32 %s1061_s25, 4  ;;  %s54_s21 = sshll.u32 %s1062_s5, 4  ;;  %s35_s26 = int_to_ptr.vmem [resolvable:$true] %s34_s26  ;;  %s55_s21 = int_to_ptr.vmem [resolvable:$true] %s54_s21 }
  0x49   :  { %s865_s29 = scalar_lea.hbm %s1355_s0, 128 }
  0x4a   :  { %p866_p4 = scmp.ne.s32.totalorder %s1355_s0, %s865_s29  ;;  %p869_p5 = scmp.lt.u32.totalorder %s865_s29, %s1355_s0 }
  0x4c   :  { %p871_p6 = pnand %p869_p5, %p866_p4 }
  0x4e   :  { %874 = shalt.err (!%p871_p6)
}
  0x4f   :  { %s875_s9 = scalar_lea.vmem %s35_s26, 128  ;;  %p880_p8 = scmp.lt.s32.totalorder %s35_s26, %s35_s26 }
  0x50   :  { %p876_p7 = scmp.ne.s32.totalorder %s35_s26, %s875_s9  ;;  %p881_p9 = scmp.lt.s32.totalorder %s875_s9, %s875_s9 }
  0x52   :  { %p882_p10 = por %p881_p9, %p880_p8 }
  0x54   :  { %p883_p11 = pnand %p882_p10, %p876_p7 }
  0x56   :  { %886 = shalt.err (!%p883_p11)
}
  0x57   :  { %37 = dma.hbm_to_vmem [thread:$0]  %s1355_s0, 128, %s35_s26, [#allocation3]  }
  0x58   :  { %s887_s24 = scalar_lea.hbm %s1357_s2, 128 }
  0x59   :  { %p888_p12 = scmp.ne.s32.totalorder %s1357_s2, %s887_s24  ;;  %p891_p13 = scmp.lt.u32.totalorder %s887_s24, %s1357_s2 }
  0x5b   :  { %p893_p0 = pnand %p891_p13, %p888_p12 }
  0x5d   :  { %896 = shalt.err (!%p893_p0)
}
  0x5e   :  { %s897_s27 = scalar_lea.vmem %s55_s21, 128  ;;  %p902_p2 = scmp.lt.s32.totalorder %s55_s21, %s55_s21 }
  0x5f   :  { %p898_p1 = scmp.ne.s32.totalorder %s55_s21, %s897_s27  ;;  %p903_p3 = scmp.lt.s32.totalorder %s897_s27, %s897_s27 }
  0x61   :  { %p904_p4 = por %p903_p3, %p902_p2 }
  0x63   :  { %p905_p5 = pnand %p904_p4, %p898_p1 }
  0x65   :  { %908 = shalt.err (!%p905_p5)
}
  0x66   :  { %57 = dma.hbm_to_vmem [thread:$0]  %s1357_s2, 128, %s55_s21, [#allocation6]  }
  0x67   :  { %s1063_s28 = smov [#allocation10]   ;;  %s1064_s16 = smov [#allocation13]  }
  0x68   :  { %s80_s29 = sshll.u32 %s1063_s28, 4  ;;  %s102_s18 = sshll.u32 %s1064_s16, 4  ;;  %s81_s29 = int_to_ptr.vmem [resolvable:$true] %s80_s29  ;;  %s103_s18 = int_to_ptr.vmem [resolvable:$true] %s102_s18 }
  0x69   :  { %s909_s9 = scalar_lea.hbm %s1361_s6, 16 }
  0x6a   :  { %p910_p6 = scmp.ne.s32.totalorder %s1361_s6, %s909_s9  ;;  %p913_p7 = scmp.lt.u32.totalorder %s909_s9, %s1361_s6 }
  0x6c   :  { %p915_p8 = pnand %p913_p7, %p910_p6 }
  0x6e   :  { %918 = shalt.err (!%p915_p8)
}
  0x6f   :  { %s919_s2 = scalar_lea.vmem %s81_s29, 16  ;;  %s923_s21 = scalar_lea.vmem %s81_s29, 32 }
  0x70   :  { %p920_p9 = scmp.ne.s32.totalorder %s81_s29, %s919_s2  ;;  %p924_p10 = scmp.lt.s32.totalorder %s81_s29, %s81_s29 }
  0x71   :  { %p925_p11 = scmp.lt.s32.totalorder %s923_s21, %s919_s2 }
  0x73   :  { %p926_p12 = por %p925_p11, %p924_p10 }
  0x75   :  { %p927_p13 = pnand %p926_p12, %p920_p9 }
  0x77   :  { %930 = shalt.err (!%p927_p13)
}
  0x78   :  { %83 = dma.hbm_to_vmem [thread:$0]  %s1361_s6, 16, %s81_s29, [#allocation9]  }
  0x79   :  { %s931_s5 = scalar_lea.hbm %s1363_s8, 16 }
  0x7a   :  { %p932_p0 = scmp.ne.s32.totalorder %s1363_s8, %s931_s5  ;;  %p935_p1 = scmp.lt.u32.totalorder %s931_s5, %s1363_s8 }
  0x7c   :  { %p937_p2 = pnand %p935_p1, %p932_p0 }
  0x7e   :  { %940 = shalt.err (!%p937_p2)
}
  0x7f   :  { %s941_s16 = scalar_lea.vmem %s103_s18, 16  ;;  %s945_s20 = scalar_lea.vmem %s103_s18, 32 }
  0x80   :  { %p942_p3 = scmp.ne.s32.totalorder %s103_s18, %s941_s16  ;;  %p946_p4 = scmp.lt.s32.totalorder %s103_s18, %s103_s18 }
  0x81   :  { %p947_p5 = scmp.lt.s32.totalorder %s945_s20, %s941_s16 }
  0x83   :  { %p948_p6 = por %p947_p5, %p946_p4 }
  0x85   :  { %p949_p7 = pnand %p948_p6, %p942_p3 }
  0x87   :  { %952 = shalt.err (!%p949_p7)
}
  0x88   :  { %105 = dma.hbm_to_vmem [thread:$0]  %s1363_s8, 16, %s103_s18, [#allocation12]  }
  0x89   :  { %s1065_s22 = smov [#allocation16]   ;;  %s953_s17 = scalar_lea.hbm %s1365_s10, 16 }
  0x8a   :  { %s124_s9 = sshll.u32 %s1065_s22, 4  ;;  %p954_p8 = scmp.ne.s32.totalorder %s1365_s10, %s953_s17  ;;  %s125_s9 = int_to_ptr.vmem [resolvable:$true] %s124_s9 }
  0x8b   :  { %p957_p9 = scmp.lt.u32.totalorder %s953_s17, %s1365_s10 }
  0x8d   :  { %p959_p10 = pnand %p957_p9, %p954_p8 }
  0x8f   :  { %962 = shalt.err (!%p959_p10)
}
  0x90   :  { %s963_s7 = scalar_lea.vmem %s125_s9, 16  ;;  %s967_s8 = scalar_lea.vmem %s125_s9, 32 }
  0x91   :  { %p964_p11 = scmp.ne.s32.totalorder %s125_s9, %s963_s7  ;;  %p968_p12 = scmp.lt.s32.totalorder %s125_s9, %s125_s9 }
  0x92   :  { %p969_p13 = scmp.lt.s32.totalorder %s967_s8, %s963_s7 }
  0x94   :  { %p970_p0 = por %p969_p13, %p968_p12 }
  0x96   :  { %p971_p1 = pnand %p970_p0, %p964_p11 }
  0x98   :  { %974 = shalt.err (!%p971_p1)
}
  0x99   :  { %127 = dma.hbm_to_vmem [thread:$0]  %s1365_s10, 16, %s125_s9, [#allocation15]  }
  0x9a   :  { %1041 = dma.done.wait [#allocation3], 128  }
  0x9b   :  { %1042 = vsyncadd [#allocation3], 4294967168 }
  0x9c   :  { %1043 = dma.done.wait [#allocation6], 256  }
  0x9d   :  { %1044 = vsyncadd [#allocation6], 4294967040 }
  0x9e   :  { %1045 = dma.done.wait [#allocation9], 528  }
  0x9f   :  { %1046 = vsyncadd [#allocation9], 4294966768 }
  0xa0   :  { %1047 = dma.done.wait [#allocation12], 528  }
  0xa1   :  { %1048 = vsyncadd [#allocation12], 4294966768 }
  0xa2   :  { %1049 = dma.done.wait [#allocation15], 272  }
  0xa3   :  { %1050 = vsyncadd [#allocation15], 4294967024  ;;  %v1066_v0 = vmov 0.0|0.0   ;;  %vm1067_vm0 = vmmov 0   ;;  %v1068_v1 = vmov 0.0   ;;  %v160_v2 = vld [vmem:[#allocation14] sm:$0xff] }
  0xa4   :  { %725 = vmatprep.subr.bf16.mxu0 %v1066_v0  ;;  %684 = vmatprep.mubr.msk.f32.mxu0 %vm1067_vm0, %v1068_v1  ;;  %v161_v3 = vld [vmem:[#allocation14 + $0x8] sm:$0xff]  ;;  %vm169_vm1 = vcmask 130048   ;;  %vm339_vm2 = vcmask 64512   ;;  %v246_v11 = vld [vmem:[%s1366_s11 + $0x10] sm:$0xff]  ;;  %v247_v12 = vld [vmem:[%s1366_s11 + $0x18] sm:$0xff]  ;;  %vm255_vm3 = vcmask 261120  }
  0xa5   :  { %728 = vmatprep.subr.bf16.mxu1 %v1066_v0  ;;  %695 = vmatprep.mubr.msk.f32.mxu1 %vm1067_vm0, %v1068_v1  ;;  %v726_v4 = vpack.c.bf16 %v161_v3, %v160_v2  ;;  %v159_v5 = vld [vmem:[#allocation5] sm:$0xff]  ;;  %v331_v6 = vld [vmem:[%s1358_s3] sm:$0xff]  ;;  %v414_v13 = vld [vmem:[#allocation8] sm:$0xff]  ;;  %v732_v14 = vpack.c.bf16 %v247_v12, %v246_v11  ;;  %s1070_s9 = smov [#allocation17]  }
  0xa6   :  { %v330_v7 = vld [vmem:[#allocation2] sm:$0xff]  ;;  %v245_v9 = vld [vmem:[%s1366_s11 + $0x8] sm:$0xff]  ;;  %v417_v18 = vld [vmem:[#allocation8 + $0x18] sm:$0xff]  ;;  %s610_s1 = sshll.u32 %s1070_s9, 4  ;;  %s611_s1 = int_to_ptr.vmem [resolvable:$true] %s610_s1 }
  0xa7   :  { %727 = vmatpush3.bf16.msra.mxu0 %v726_v4  ;;  %v244_v8 = vld [vmem:[%s1366_s11] sm:$0xff]  ;;  %v416_v17 = vld [vmem:[#allocation8 + $0x10] sm:$0xff]  ;;  %v502_v34 = vld [vmem:[#allocation11 + $0x18] sm:$0xff] }
  0xa8   :  { %698 = vmatprep.subr.mxu0 %v1068_v1  ;;  %v729_v10 = vpack.c.bf16 %v245_v9, %v244_v8  ;;  %v415_v15 = vld [vmem:[#allocation8 + $0x8] sm:$0xff]  ;;  %v738_v19 = vpack.c.bf16 %v417_v18, %v416_v17  ;;  %v650_v20 = vld [vmem:[#allocation16] ss:$0 sm:$0xff]  ;;  %v656_v40 = vld [vmem:[#allocation10] ss:$0 sm:$0xff] }
  0xa9   :  { %v735_v16 = vpack.c.bf16 %v415_v15, %v414_v13  ;;  %v654_v24 = vld [vmem:[%s1359_s4] ss:$0 sm:$0xff]  ;;  %v500_v31 = vld [vmem:[#allocation11 + $0x8] sm:$0xff]  ;;  %v501_v32 = vld [vmem:[#allocation11 + $0x10] sm:$0xff] }
  0xaa   :  { %685 = vmatmul.mubr.msk.f32.vlgmr.msra.gmra.mrb[0].mxu0 %vm169_vm1, %v159_v5  ;;  %730 = vmatpush3.bf16.msra.mxu1 %v729_v10  ;;  %v499_v30 = vld [vmem:[#allocation11] sm:$0xff]  ;;  %v744_v35 = vpack.c.bf16 %v502_v34, %v501_v32  ;;  %v584_v45 = vld [vmem:[#allocation7] sm:$0xff] }
  0xab   :  { %699 = vmatpush3.msra.mxu0 %v331_v6  ;;  %700 = vmatprep.mubr.msk.f32.mxu0 %vm1067_vm0, %v1068_v1  ;;  %v741_v33 = vpack.c.bf16 %v500_v31, %v499_v30  ;;  %v652_v36 = vld [vmem:[%s1367_s12] ss:$0 sm:$0xff]  ;;  %v585_v46 = vadd.f32 1e-20, %v584_v45  ;;  %v658_v53 = vld [vmem:[#allocation13] ss:$0 sm:$0xff] }
  0xac   :  { %734 = vmatprep.subr.bf16.mxu0 %v1066_v0  ;;  %731 = vmatprep.subr.bf16.mxu1 %v1066_v0  ;;  %s1069_s12 = smov [#allocation18]  }
  0xad   :  { %s620_s22 = sshll.u32 %s1069_s12, 4  ;;  %s621_s22 = int_to_ptr.vmem [resolvable:$true] %s620_s22 }
  0xae   :  { %701 = vmatmul.mubr.msk.f32.vlgmr.msra.gmra.mrb[2].mxu0 %vm339_vm2, %v330_v7  ;;  %733 = vmatpush3.bf16.msra.mxu1 %v732_v14  ;;  %s975_s19 = scalar_lea.vmem %s621_s22, 128  ;;  %p980_p3 = scmp.lt.s32.totalorder %s621_s22, %s621_s22 }
  0xaf   :  { %711 = vmatprep.mubr.msk.f32.mxu0 %vm1067_vm0, %v1068_v1  ;;  %736 = vmatpush3.bf16.msra.mxu0 %v735_v16  ;;  %p976_p2 = scmp.ne.s32.totalorder %s621_s22, %s975_s19  ;;  %p981_p4 = scmp.lt.s32.totalorder %s975_s19, %s975_s19 }
  0xb0   :  { %737 = vmatprep.subr.bf16.mxu0 %v1066_v0  ;;  %740 = vmatprep.subr.bf16.mxu1 %v1066_v0 }
  0xb1   :  { %p982_p5 = por %p981_p4, %p980_p3 }
  0xb3   :  { %739 = vmatpush3.bf16.msra.mxu0 %v738_v19  ;;  %p983_p6 = pnand %p982_p5, %p976_p2 }
 0x17d   :  { %v239_v21 = vpop.f32.mrb[0].mxu0 }
 0x17e   :  { %v240_v22 = vadd.f32 %v650_v20, %v239_v21  ;;  %v686_v23 = vpop.f32.mrb[1].mxu0 }
 0x180   :  { %763 = vtanh.f32 %v240_v22 }
 0x181   :  { %v409_v25 = vpop.f32.mrb[2].mxu0 }
 0x182   :  { %v410_v26 = vadd.f32 %v654_v24, %v409_v25  ;;  %v702_v27 = vpop.f32.mrb[3].mxu0 }
 0x184   :  { %765 = vtanh.f32 %v410_v26 }
 0x18a   :  { %v764_v28 = vpop.eup %763 }
 0x18b   :  { %696 = vmatmul.mubr.msk.f32.vlgmr.msra.gmra.mrb[0].mxu1 %vm255_vm3, %v764_v28 }
 0x18c   :  { %722 = vmatprep.mubr.msk.f32.mxu1 %vm1067_vm0, %v1068_v1  ;;  %742 = vmatpush3.bf16.msra.mxu1 %v741_v33 }
 0x18d   :  { %743 = vmatprep.subr.bf16.mxu1 %v1066_v0 }
 0x18e   :  { %v766_v29 = vpop.eup %765 }
 0x18f   :  { %712 = vmatmul.mubr.msk.f32.vlgmr.msra.gmra.mrb[4].mxu0 %vm255_vm3, %v766_v29 }
 0x190   :  { %745 = vmatpush3.bf16.msra.mxu1 %v744_v35 }
 0x25e   :  { %v325_v37 = vpop.f32.mrb[0].mxu1 }
 0x25f   :  { %v326_v38 = vadd.f32 %v652_v36, %v325_v37  ;;  %v697_v39 = vpop.f32.mrb[1].mxu1 }
 0x261   :  { %329 = vst [vmem:[#allocation17] sm:$0xff] %v326_v38 }
 0x262   :  { %v494_v41 = vpop.f32.mrb[4].mxu0 }
 0x263   :  { %v495_v42 = vadd.f32 %v656_v40, %v494_v41  ;;  %v713_v43 = vpop.f32.mrb[5].mxu0 }
 0x265   :  { %767 = vtanh.f32 %v495_v42 }
 0x266   :  { %769 = vlog2.f32 %v585_v46 }
 0x26f   :  { %v768_v44 = vpop.eup %767 }
 0x270   :  { %723 = vmatmul.mubr.msk.f32.vlgmr.msra.gmra.mrb[2].mxu1 %vm255_vm3, %v768_v44  ;;  %v770_v47 = vpop.eup %769 }
 0x271   :  { %v587_v48 = vmul.f32 0.6931472, %v770_v47 }
 0x273   :  { %v588_v49 = vsub.f32 0.0, %v587_v48 }
 0x275   :  { %v589_v50 = vadd.f32 1e-20, %v588_v49 }
 0x277   :  { %771 = vlog2.f32 %v589_v50 }
 0x281   :  { %v772_v51 = vpop.eup %771 }
 0x282   :  { %v591_v52 = vmul.f32 0.6931472, %v772_v51 }
 0x284   :  { %v592_v54 = vsub.f32 0.0, %v591_v52 }
 0x343   :  { %v579_v55 = vpop.f32.mrb[2].mxu1 }
 0x344   :  { %v580_v56 = vadd.f32 %v658_v53, %v579_v55  ;;  %v724_v57 = vpop.f32.mrb[3].mxu1 }
 0x346   :  { %583 = vst [vmem:[#allocation18] sm:$0xff] %v580_v56  ;;  %v593_v58 = vadd.f32 %v592_v54, %v580_v56 }
 0x348   :  { %594 = vmax.xlane.f32.xlu0 %v593_v58 }
 0x3d5   :  { %v595_v59 = vpop.xlane.xlu0 %594 }
 0x3d6   :  { %v596_v60 = vsub.f32 %v593_v58, %v595_v59 }
 0x3d8   :  { %v597_v61 = vmul.f32 1.442695, %v596_v60 }
 0x3da   :  { %773 = vpow2.f32 %v597_v61 }
 0x3e4   :  { %v774_v62 = vpop.eup %773 }
 0x3e5   :  { %599 = vadd.xlane.f32.xlu0 %v774_v62 }
 0x3e6   :  { %986 = shalt.err (!%p983_p6)
}
 0x3e7   :  { %s987_s2 = scalar_lea.hbm %s1369_s14, 128 }
 0x3e8   :  { %p988_p7 = scmp.ne.s32.totalorder %s1369_s14, %s987_s2  ;;  %p991_p8 = scmp.lt.u32.totalorder %s987_s2, %s1369_s14 }
 0x3ea   :  { %p993_p9 = pnand %p991_p8, %p988_p7 }
 0x3ec   :  { %996 = shalt.err (!%p993_p9)
}
 0x3ed   :  { %623 = dma.vmem_to_hbm [thread:$0]  %s621_s22, 128, %s1369_s14, [#allocation19]  }
 0x3ee   :  { %s997_s10 = scalar_lea.vmem %s611_s1, 128  ;;  %p1002_p11 = scmp.lt.s32.totalorder %s611_s1, %s611_s1 }
 0x3ef   :  { %p998_p10 = scmp.ne.s32.totalorder %s611_s1, %s997_s10  ;;  %p1003_p12 = scmp.lt.s32.totalorder %s997_s10, %s997_s10 }
 0x3f1   :  { %p1004_p13 = por %p1003_p12, %p1002_p11 }
 0x3f3   :  { %p1005_p0 = pnand %p1004_p13, %p998_p10 }
 0x3f5   :  { %1008 = shalt.err (!%p1005_p0)
}
 0x3f6   :  { %s1009_s27 = scalar_lea.hbm %s1368_s13, 128 }
 0x3f7   :  { %p1010_p1 = scmp.ne.s32.totalorder %s1368_s13, %s1009_s27  ;;  %p1013_p2 = scmp.lt.u32.totalorder %s1009_s27, %s1368_s13 }
 0x3f9   :  { %p1015_p3 = pnand %p1013_p2, %p1010_p1 }
 0x3fb   :  { %1018 = shalt.err (!%p1015_p3)
}
 0x3fc   :  { %613 = dma.vmem_to_hbm [thread:$0]  %s611_s1, 128, %s1368_s13, [#allocation4]  }
 0x3fd   :  { %s1071_s20 = smov [#allocation20]  }
 0x3fe   :  { %s630_s11 = sshll.u32 %s1071_s20, 4  ;;  %s631_s11 = int_to_ptr.vmem [resolvable:$true] %s630_s11 }
 0x3ff   :  { %s1019_s6 = scalar_lea.vmem %s631_s11, 128  ;;  %p1024_p5 = scmp.lt.s32.totalorder %s631_s11, %s631_s11 }
 0x400   :  { %p1020_p4 = scmp.ne.s32.totalorder %s631_s11, %s1019_s6  ;;  %p1025_p6 = scmp.lt.s32.totalorder %s1019_s6, %s1019_s6 }
 0x402   :  { %p1026_p7 = por %p1025_p6, %p1024_p5 }
 0x404   :  { %p1027_p8 = pnand %p1026_p7, %p1020_p4 }
 0x472   :  { %v600_v63 = vpop.xlane.xlu0 %599 }
 0x473   :  { %775 = vrcp.f32 %v600_v63 }
 0x47d   :  { %v776_v0 = vpop.eup %775 }
 0x47e   :  { %v602_v1 = vmul.f32 %v776_v0, %v774_v62 }
 0x480   :  { %603 = vst [vmem:[#allocation20] sm:$0xff] %v602_v1 }
 0x481   :  { %1030 = shalt.err (!%p1027_p8)
}
 0x482   :  { %s1031_s12 = scalar_lea.hbm %s1370_s15, 128 }
 0x483   :  { %p1032_p9 = scmp.ne.s32.totalorder %s1370_s15, %s1031_s12  ;;  %p1035_p10 = scmp.lt.u32.totalorder %s1031_s12, %s1370_s15 }
 0x485   :  { %p1037_p11 = pnand %p1035_p10, %p1032_p9 }
 0x487   :  { %1040 = shalt.err (!%p1037_p11)
}
 0x488   :  { %633 = dma.vmem_to_hbm [thread:$0]  %s631_s11, 128, %s1370_s15, [#allocation19]  }
 0x489   :  { %1051 = dma.done.wait [#allocation4], 128  }
 0x48a   :  { %1052 = vsyncadd [#allocation4], 4294967168 }
 0x48b   :  { %1053 = dma.done.wait [#allocation19], 256  }
 0x48c   :  { %1054 = vsyncadd [#allocation19], 4294967040 }
 0x48d   :  { %643 = vsyncpa [#allocation3], 1 }
 0x48e   :  { %644 = vsyncpa [#allocation6], 1 }
 0x48f   :  { %645 = vsyncpa [#allocation9], 1 }
 0x490   :  { %646 = vsyncpa [#allocation12], 1 }
 0x491   :  { %647 = vsyncpa [#allocation15], 1 }
 0x492   :  { %648 = vsyncpa [#allocation4], 1 }
 0x493   :  { %649 = vsyncpa [#allocation19], 1 }

</bundles_post_ra>
